<compile_context>
chip_gen: v7x
topology: tpu7x:2x2x1
jax: 0.10.0
libtpu: 0.0.40
codegen_flags: <defaults>
</compile_context>

<pallas_src>
import math
from functools import partial

import jax
import jax.numpy as jnp
from jax.experimental import pallas as pl
from jax.experimental.pallas import tpu as pltpu


def _cdiv(a, b):
    return -(-a // b)


def _round_up(x, m):
    return _cdiv(x, m) * m


def _vmem_limit_bytes():
    """Generation-aware VMEM limit: ~38 MiB on v7x (64 MiB/TC), ~76 MiB on v5e/v6e."""
    cap = 64 * 1024 * 1024  # conservative default = v7x physical VMEM per TensorCore
    try:
        cap = int(getattr(pltpu.get_tpu_info(), "vmem_capacity_bytes", cap))
    except Exception:
        pass
    return max(32 * 1024 * 1024, min(int(cap * 0.6), 100 * 1024 * 1024))


def _choose_row_tile(H, W, KC, E, out_bytes, B, vmem_budget, min_programs=4):
    """Pick TR (output rows per grid step) from the VMEM budget, keep >= min_programs
    grid points (v7x megacore), keep TR*W 16-aligned, and minimize row padding."""
    # Per-output-row VMEM footprint.  Small minor dims (KC, E) are padded to the
    # 128-lane tile inside VMEM, so account with the padded sizes.
    kc_v = _round_up(KC, 128)
    e_v = _round_up(E, 128)
    per_row = W * (kc_v * 2 * 3                  # bf16 input: double buffer + one tap copy
                   + e_v * (2 * out_bytes + 4)   # output double buffer + f32 accumulator
                   ) + 1024
    tr_budget = max(1, vmem_budget // per_row)

    # TR*W must stay a multiple of 16 so the (TR*W, E) output block is tile-aligned
    # for bf16 stores (and trivially satisfies the (8, 128) BlockSpec rule).
    step = 16 // math.gcd(W, 16)

    n_min = max(_cdiv(H, tr_budget), _cdiv(min_programs, max(B, 1)), 1)
    candidates = []
    for nt in range(n_min, n_min + 17):
        tr = max(step, _round_up(_cdiv(H, nt), step))
        nta = _cdiv(H, tr)
        candidates.append((nta * tr - H, nta, tr))   # (padded rows, grid steps, tile rows)
    waste, n_tiles, tr = min(candidates)
    return tr, n_tiles, n_tiles * tr


def _patch_embed_kernel(x_ref, w_ref, o_ref, *, row_pixels):
    # x_ref: (1, 1, (TR+2)*W, 3C) bf16  -- one row tile (flattened pixels) incl. 1-row halo
    # w_ref: (3, 3C, E)           bf16  -- folded 3x3 conv weight, row-tap major
    # o_ref: (1, TR*W, E)               -- output tokens for this tile
    n_tok = o_ref.shape[1]
    acc = jnp.zeros((n_tok, w_ref.shape[2]), jnp.float32)
    for kh in range(3):                              # 3 row taps formed in VMEM
        tap = x_ref[0, 0, pl.ds(kh * row_pixels, n_tok), :]
        acc += jnp.dot(tap, w_ref[kh], preferred_element_type=jnp.float32)
    o_ref[0] = acc.astype(o_ref.dtype)


def overlap_patch_embed(x_nchw, weight_ecHW, *, out_dtype=jnp.bfloat16, min_programs=4):
    """x_nchw: (B, C, H, W); weight_ecHW: (E, C, 3, 3) (PyTorch Conv2d layout, no bias).
    Returns (B, H*W, E) == rearrange(conv3x3_s1_p1(x), 'b c h w -> b (h w) c')."""
    B, C, H, W = x_nchw.shape
    E = weight_ecHW.shape[0]
    HW = H * W
    KC = 3 * C
    out_bytes = jnp.dtype(out_dtype).itemsize

    # ---- wrapper glue (XLA): bf16 first, NCHW -> NHWC ----
    xb = jnp.transpose(x_nchw.astype(jnp.bfloat16), (0, 2, 3, 1))          # (B, H, W, C)

    # Column (kw) taps only -> (B, H, W, 3C); row (kh) taps are built in-kernel,
    # so HBM holds 3C per pixel instead of 9C.
    x_wpad = jnp.pad(xb, ((0, 0), (0, 0), (1, 1), (0, 0)))
    x_cols = jnp.concatenate([x_wpad[:, :, kw:kw + W, :] for kw in range(3)], axis=-1)

    vmem_limit = _vmem_limit_bytes()
    TR, n_tiles, H_pad = _choose_row_tile(
        H, W, KC, E, out_bytes, B,
        vmem_budget=int(vmem_limit * 0.6), min_programs=min_programs)

    # 1-row zero halo top/bottom (+ bottom padding up to H_pad), then gather the
    # overlapping (TR+2)-row window of each tile (duplicates only 2 rows per tile
    # in HBM) and flatten the pixel axis so the kernel's row-tap slices are
    # contiguous, offset-aligned slices of one dimension.
    x_rpad = jnp.pad(x_cols, ((0, 0), (1, H_pad - H + 1), (0, 0), (0, 0)))  # (B, H_pad+2, W, 3C)
    row_idx = jnp.arange(n_tiles)[:, None] * TR + jnp.arange(TR + 2)[None, :]
    x_tiles = jnp.take(x_rpad, row_idx, axis=1)                            # (B, n_tiles, TR+2, W, 3C)
    x_tiles = x_tiles.reshape(B, n_tiles, (TR + 2) * W, KC)

    # Fold (E, C, 3, 3) -> (kh, kw*C + c, E), matching the x_cols channel ordering.
    w = jnp.transpose(weight_ecHW, (2, 3, 1, 0)).reshape(3, KC, E).astype(jnp.bfloat16)

    out = pl.pallas_call(
        partial(_patch_embed_kernel, row_pixels=W),
        out_shape=jax.ShapeDtypeStruct((B, H_pad * W, E), out_dtype),
        grid_spec=pltpu.PrefetchScalarGridSpec(
            num_scalar_prefetch=0,
            grid=(B, n_tiles),
            in_specs=[
                pl.BlockSpec((1, 1, (TR + 2) * W, KC), lambda b, t: (b, t, 0, 0)),
                pl.BlockSpec((3, KC, E), lambda b, t: (0, 0, 0)),
            ],
            out_specs=pl.BlockSpec((1, TR * W, E), lambda b, t: (b, t, 0)),
        ),
        compiler_params=pltpu.CompilerParams(
            dimension_semantics=("parallel", "parallel"),
            vmem_limit_bytes=vmem_limit,
        ),
    )(x_tiles, w)

    if H_pad != H:
        # Only hit when no 16-aligned row tile divides H; padded rows are zeros.
        out = out[:, :HW, :]
    return out


def reference(x_nchw, weight_ecHW):
    # Pure-JAX reference with the same bf16 operand rounding as the kernel.
    xb = x_nchw.astype(jnp.bfloat16).astype(jnp.float32)
    wb = weight_ecHW.astype(jnp.bfloat16).astype(jnp.float32)
    y = jax.lax.conv_general_dilated(
        xb, wb, window_strides=(1, 1), padding=((1, 1), (1, 1)),
        dimension_numbers=("NCHW", "OIHW", "NCHW"))
    B, E, H, W = y.shape
    return jnp.transpose(y, (0, 2, 3, 1)).reshape(B, H * W, E)


if __name__ == "__main__":
    key = jax.random.PRNGKey(0)
    k1, k2, k3, k4 = jax.random.split(key, 4)

    # Case 1: small shapes consistent with the module; grid = (B=2) x (2 row tiles)
    # exercises the multi-tile path and keeps both v7x TensorCores busy.
    B, C, H, W, E = 2, 4, 16, 16, 32
    x = jax.random.normal(k1, (B, C, H, W), dtype=jnp.float32)
    w = jax.random.normal(k2, (E, C, 3, 3), dtype=jnp.float32) * 0.1
    out = jax.block_until_ready(overlap_patch_embed(x, w))
    ref = reference(x, w)
    assert out.shape == (B, H * W, E)
    assert jnp.allclose(out.astype(jnp.float32), ref, atol=3e-2, rtol=3e-2)

    # Case 2: H not divisible by the row tile -> exercises the padded/sliced path.
    B2, C2, H2, W2, E2 = 1, 3, 13, 32, 48
    x2 = jax.random.normal(k3, (B2, C2, H2, W2), dtype=jnp.float32)
    w2 = jax.random.normal(k4, (E2, C2, 3, 3), dtype=jnp.float32) * 0.1
    out2 = jax.block_until_ready(overlap_patch_embed(x2, w2))
    ref2 = reference(x2, w2)
    assert out2.shape == (B2, H2 * W2, E2)
    assert jnp.allclose(out2.astype(jnp.float32), ref2, atol=3e-2, rtol=3e-2)

    print("KERNEL_OK")
</pallas_src>

<mosaic_0001>
module attributes {stable_mosaic.version = 11 : i64} {
  func.func @_patch_embed_kernel(%arg0: i32, %arg1: i32, %arg2: memref<1x1x160x12xbf16, #tpu.memory_space<vmem>>, %arg3: memref<3x12x32xbf16, #tpu.memory_space<vmem>>, %arg4: memref<1x128x32xbf16, #tpu.memory_space<vmem>>) attributes {dimension_semantics = [#tpu.dimension_semantics<parallel>, #tpu.dimension_semantics<parallel>], iteration_bounds = array<i64: 2, 2>, scalar_prefetch = 0 : i64, scratch_operands = 0 : i64, tpu.core_type = #tpu.core_type<tc>, window_params = [{transform_indices = @transform_0, window_bounds = array<i64: 1, 1, 160, 12>}, {pipeline_mode = #tpu.pipeline_mode<synchronous>, transform_indices = @transform_1, window_bounds = array<i64: 3, 12, 32>}, {transform_indices = @transform_2, window_bounds = array<i64: 1, 128, 32>}]} {
    %cst = arith.constant 0.000000e+00 : f32
    %0 = vector.broadcast %cst : f32 to vector<128x32xf32>
    %c0 = arith.constant 0 : index
    %c0_0 = arith.constant 0 : index
    %c0_1 = arith.constant 0 : index
    %c0_2 = arith.constant 0 : index
    %1 = vector.load %arg2[%c0, %c0_0, %c0_1, %c0_2] : memref<1x1x160x12xbf16, #tpu.memory_space<vmem>>, vector<1x1x128x12xbf16>
    %2 = vector.shape_cast %1 : vector<1x1x128x12xbf16> to vector<128x12xbf16>
    %c0_3 = arith.constant 0 : index
    %c0_4 = arith.constant 0 : index
    %c0_5 = arith.constant 0 : index
    %3 = vector.load %arg3[%c0_3, %c0_4, %c0_5] : memref<3x12x32xbf16, #tpu.memory_space<vmem>>, vector<1x12x32xbf16>
    %4 = vector.shape_cast %3 : vector<1x12x32xbf16> to vector<12x32xbf16>
    %cst_6 = arith.constant dense<0.000000e+00> : vector<128x32xf32>
    %5 = tpu.matmul %2, %4, %cst_6 {dimension_numbers = #tpu.dot_dimension_numbers<[1], [0], [0], [1], [0, 0, 1, 1], [], []>} : vector<128x12xbf16>, vector<12x32xbf16>, vector<128x32xf32> -> vector<128x32xf32>
    %6 = arith.addf %0, %5 : vector<128x32xf32>
    %c0_7 = arith.constant 0 : index
    %c0_8 = arith.constant 0 : index
    %c16 = arith.constant 16 : index
    %c0_9 = arith.constant 0 : index
    %7 = vector.load %arg2[%c0_7, %c0_8, %c16, %c0_9] : memref<1x1x160x12xbf16, #tpu.memory_space<vmem>>, vector<1x1x128x12xbf16>
    %8 = vector.shape_cast %7 : vector<1x1x128x12xbf16> to vector<128x12xbf16>
    %c1 = arith.constant 1 : index
    %c0_10 = arith.constant 0 : index
    %c0_11 = arith.constant 0 : index
    %9 = vector.load %arg3[%c1, %c0_10, %c0_11] : memref<3x12x32xbf16, #tpu.memory_space<vmem>>, vector<1x12x32xbf16>
    %10 = vector.shape_cast %9 : vector<1x12x32xbf16> to vector<12x32xbf16>
    %cst_12 = arith.constant dense<0.000000e+00> : vector<128x32xf32>
    %11 = tpu.matmul %8, %10, %cst_12 {dimension_numbers = #tpu.dot_dimension_numbers<[1], [0], [0], [1], [0, 0, 1, 1], [], []>} : vector<128x12xbf16>, vector<12x32xbf16>, vector<128x32xf32> -> vector<128x32xf32>
    %12 = arith.addf %6, %11 : vector<128x32xf32>
    %c0_13 = arith.constant 0 : index
    %c0_14 = arith.constant 0 : index
    %c32 = arith.constant 32 : index
    %c0_15 = arith.constant 0 : index
    %13 = vector.load %arg2[%c0_13, %c0_14, %c32, %c0_15] : memref<1x1x160x12xbf16, #tpu.memory_space<vmem>>, vector<1x1x128x12xbf16>
    %14 = vector.shape_cast %13 : vector<1x1x128x12xbf16> to vector<128x12xbf16>
    %c2 = arith.constant 2 : index
    %c0_16 = arith.constant 0 : index
    %c0_17 = arith.constant 0 : index
    %15 = vector.load %arg3[%c2, %c0_16, %c0_17] : memref<3x12x32xbf16, #tpu.memory_space<vmem>>, vector<1x12x32xbf16>
    %16 = vector.shape_cast %15 : vector<1x12x32xbf16> to vector<12x32xbf16>
    %cst_18 = arith.constant dense<0.000000e+00> : vector<128x32xf32>
    %17 = tpu.matmul %14, %16, %cst_18 {dimension_numbers = #tpu.dot_dimension_numbers<[1], [0], [0], [1], [0, 0, 1, 1], [], []>} : vector<128x12xbf16>, vector<12x32xbf16>, vector<128x32xf32> -> vector<128x32xf32>
    %18 = arith.addf %12, %17 : vector<128x32xf32>
    %19 = arith.truncf %18 : vector<128x32xf32> to vector<128x32xbf16>
    %c0_19 = arith.constant 0 : index
    %c0_20 = arith.constant 0 : index
    %c0_21 = arith.constant 0 : index
    %20 = vector.load %arg4[%c0_19, %c0_20, %c0_21] : memref<1x128x32xbf16, #tpu.memory_space<vmem>>, vector<1x128x32xbf16>
    %21 = vector.shape_cast %20 : vector<1x128x32xbf16> to vector<128x32xbf16>
    %22 = vector.shape_cast %19 : vector<128x32xbf16> to vector<1x128x32xbf16>
    tpu.vector_store %arg4[%c0_19, %c0_20, %c0_21], %22 {strides = array<i32>} : memref<1x128x32xbf16, #tpu.memory_space<vmem>>, vector<1x128x32xbf16>,
    return
  }
  func.func @transform_0(%arg0: i32, %arg1: i32) -> (i32, i32, i32, i32) {
    %c0_i32 = arith.constant 0 : i32
    %c0_i32_0 = arith.constant 0 : i32
    %c0_i32_1 = arith.constant 0 : i32
    return %arg0, %arg1, %c0_i32, %c0_i32_0 : i32, i32, i32, i32
  }
  func.func @transform_1(%arg0: i32, %arg1: i32) -> (i32, i32, i32) {
    %c0_i32 = arith.constant 0 : i32
    %c0_i32_0 = arith.constant 0 : i32
    %c0_i32_1 = arith.constant 0 : i32
    %c0_i32_2 = arith.constant 0 : i32
    return %c0_i32, %c0_i32_0, %c0_i32_1 : i32, i32, i32
  }
  func.func @transform_2(%arg0: i32, %arg1: i32) -> (i32, i32, i32) {
    %c0_i32 = arith.constant 0 : i32
    %c0_i32_0 = arith.constant 0 : i32
    return %arg0, %arg1, %c0_i32 : i32, i32, i32
  }
}

</mosaic_0001>

<bundles_post_ra>
// kernel: tpu_custom_call.1
= control target key start
LH: loop header
LB: loop body
LE: loop exit
PB: predicated region body
PF: predicated region fallthrough
CT: control target
= control target key end

     0   :  { %s1194_s9 = smov 0   ;;  %s1196_s10 = smov 0   ;;  %s1347_s0 = inlined_call_operand.vmem [shape: bf16[2,2,160,12], index: 0, kind: input, shape index: {}]   ;;  %s1348_s1 = inlined_call_operand.vmem [shape: bf16[3,12,32], index: 1, kind: input, shape index: {}]   ;;  %s1349_s2 = inlined_call_operand.vmem [shape: bf16[2,256,32], index: 2, kind: output, shape index: {}]  }
   0x1   :  { %s1198_s11 = smov 0   ;;  %s1200_s12 = smov 0  }
   0x2   :  { %s1202_s13 = smov 0  }
   0x3 LB: > { %s21_s14 = sadd.s32 1, %s1169_s11  ;;  %s24_s15 = sadd.s32 1, %s1173_s12  ;;  %s1177_s13 = sphi %s1202_s13, %s12_s13   ;;  %s1173_s12 = sphi %s1200_s12, %s1353_s12   ;;  %s1169_s11 = sphi %s1198_s11, %s1352_s11   ;;  %s1165_s10 = sphi %s1196_s10, %s1351_s10   ;;  %s1161_s9 = sphi %s1194_s9, %s1350_s9  }
   0x4   : > { %p22_p0 = scmp.ge.s32.totalorder %s21_s14, 2  ;;  %p871_p1 = scmp.ge.s32.totalorder %s1177_s13, 1 }
   0x5   : > { %p132_p2 = scmp.lt.s32.totalorder %s1177_s13, 5 }
   0x6   : > { %s1355_s14 = smov (%p22_p0, %s21_s14), 0  ;;  %s1357_s15 = smov (!%p22_p0, %s24_s15), %s1173_s12 }
   0x7   : > { %p133_p3 = pnand %p871_p1, %p132_p2  ;;  %p26_p4 = scmp.ge.s32.totalorder %s1357_s15, 2 }
   0x8   : > { %v1119_v0 = vld [vmem:[%s1348_s1 + $0x8] sm:$0x3f] (!%p133_p3)   ;;  %vm275_vm0 = vcmask (!%p133_p3), 1045504   ;;  %p162_p5 = scmp.lt.s32.totalorder (!%p133_p3), %s1165_s10, 1  ;;  %v1120_v1 = vld [vmem:[%s1348_s1] sm:$0x3f] (!%p133_p3)  }
   0x9   : > { %s1359_s15 = smov (%p26_p4, %s1357_s15), 0  ;;  %136 = sbr.rel (%p133_p3) target bundleno = 286 (0x11e), region = 28 }
   0xa   : > { %1073 = vmatprep.subr.msk.bf16.mxu1 (!%p133_p3), %vm275_vm0, %v1119_v0  ;;  %v277_v2 = vsel (!%p133_p3), %vm275_vm0, %v1119_v0, 0  ;;  %p164_p6 = scmp.lt.s32.totalorder (!%p133_p3), %s1161_s9, 1  ;;  %1074 = vmatprep.subr.msk.bf16.mxu0 (!%p133_p3), %vm275_vm0, %v1120_v1  ;;  %v390_v3 = vsel (!%p133_p3), %vm275_vm0, %v1120_v1, 0  ;;  %v1123_v4 = vld [vmem:[%s1348_s1 + $0x10] sm:$0x3f] (!%p133_p3)   ;;  %vm250_vm1 = vcmask (!%p133_p3), 97280  }
   0xb   : > { %986 = vmatpush3.bf16.msra.mxu1 (!%p133_p3), %v277_v2  ;;  %1004 = vmatpush3.bf16.msra.mxu0 (!%p133_p3), %v390_v3  ;;  %v578_v8 = vsel (!%p133_p3), %vm275_vm0, %v1123_v4, 0  ;;  %s873_s30 = sshll.u32 (!%p133_p3), %s1161_s9, 4  ;;  %vm757_vm2 = vcmask (!%p133_p3), 257024  }
   0xc   : > { %1075 = vmatprep.subr.msk.bf16.mxu1 (!%p133_p3), %vm275_vm0, %v1120_v1  ;;  %1076 = vmatprep.subr.msk.bf16.mxu0 (!%p133_p3), %vm275_vm0, %v1123_v4  ;;  %p174_p7 = scmp.lt.s32.totalorder (!%p133_p3), %s873_s30, 31 }
  0x10   : > { %s1361_s10 = smov (!%p162_p5, %s1165_s10), 1  ;;  %s1363_s30 = smov (!%p174_p7, %s873_s30), 31 }
  0x11   : > { %s165_s20 = scalar_select %p164_p6, %s1161_s9, 1 }
  0x12   : > { %s1078_s23 = smul.u32 40, %s1361_s10  ;;  %s874_s3 = sshll.u32 %s1361_s10, 5 }
  0x13   : > { %s1077_s24 = smul.u32 20, %s165_s20  ;;  %s177_s4 = sadd.s32 %s874_s3, %s1363_s30 }
  0x14   : > { %s875_s5 = sshll.u32 %s177_s4, 2 }
  0x15   : > { %s168_s25 = sadd.s32 %s1078_s23, %s1077_s24  ;;  %s1298_s8 = scalar_lea.vmem %s1349_s2, %s875_s5 }
  0x16   : > { %s872_s26 = sshll.u32 %s168_s25, 2 }
  0x17   : > { %s1249_s29 = scalar_lea.vmem %s1347_s0, %s872_s26 }
  0x18   : > { %v1121_v5 = vld [vmem:[%s1249_s29 + $0x8] sm:$0xff]   ;;  %v1122_v6 = vld [vmem:[%s1249_s29] sm:$0xff]   ;;  %v1124_v7 = vld [vmem:[%s1249_s29 + $0x10] sm:$0xff]  }
  0x19   : > { %987 = vmatprep.mubr.msk.bf16.mxu1 %vm250_vm1, %v1121_v5  ;;  %1005 = vmatprep.mubr.msk.bf16.mxu0 %vm250_vm1, %v1122_v6  ;;  %v1125_v9 = vld [vmem:[%s1249_s29 + $0x18] sm:$0xff]   ;;  %v1126_v10 = vld [vmem:[%s1249_s29 + $0x20] sm:$0xff]   ;;  %v1127_v11 = vld [vmem:[%s1249_s29 + $0x28] sm:$0xff]  }
  0x1a   : > { %988 = vmatmul.mubr.msk.bf16.vlgmr.msra.gmra.mrb[0].mxu1 %vm250_vm1, %v1124_v7  ;;  %1006 = vmatmul.mubr.msk.bf16.vlgmr.msra.gmra.mrb[0].mxu0 %vm250_vm1, %v1121_v5  ;;  %v1128_v12 = vld [vmem:[%s1249_s29 + $0x10] sm:$0xff]   ;;  %v1130_v14 = vld [vmem:[%s1249_s29 + $0x18] sm:$0xff]   ;;  %v1132_v16 = vld [vmem:[%s1249_s29 + $0x20] sm:$0xff]  }
  0x1b   : > { %1040 = vmatpush3.bf16.msra.mxu1 %v390_v3  ;;  %1022 = vmatpush3.bf16.msra.mxu0 %v578_v8  ;;  %v1129_v13 = vld [vmem:[%s1249_s29 + $0x30] sm:$0xff]   ;;  %v1131_v15 = vld [vmem:[%s1249_s29 + $0x38] sm:$0xff]   ;;  %v1133_v17 = vld [vmem:[%s1249_s29 + $0x40] sm:$0xff]  }
  0x1c   : > { %991 = vmatprep.mubr.msk.bf16.mxu1 %vm250_vm1, %v1125_v9  ;;  %1009 = vmatprep.mubr.msk.bf16.mxu0 %vm250_vm1, %v1124_v7  ;;  %v1134_v18 = vld [vmem:[%s1249_s29 + $0x28] sm:$0xff]   ;;  %v1135_v19 = vld [vmem:[%s1249_s29 + $0x30] sm:$0xff]   ;;  %v1136_v20 = vld [vmem:[%s1249_s29 + $0x38] sm:$0xff]  }
  0x1d   : > { %v1137_v21 = vld [vmem:[%s1249_s29 + $0x40] sm:$0xff]   ;;  %v1138_v22 = vld [vmem:[%s1249_s29 + $0x48] sm:$0xff]  }
  0x22   : > { %992 = vmatmul.mubr.msk.bf16.gmra.mrb[4].mxu1 %vm250_vm1, %v1126_v10  ;;  %1010 = vmatmul.mubr.msk.bf16.gmra.mrb[4].mxu0 %vm250_vm1, %v1125_v9 }
  0x23   : > { %995 = vmatprep.mubr.msk.bf16.mxu1 %vm250_vm1, %v1127_v11  ;;  %1023 = vmatprep.mubr.msk.bf16.mxu0 %vm250_vm1, %v1128_v12 }
  0x2a   : > { %996 = vmatmul.mubr.msk.bf16.gmra.mrb[8].mxu1 %vm250_vm1, %v1129_v13  ;;  %1024 = vmatmul.mubr.msk.bf16.vlgmr.msra.gmra.mrb[0].mxu0 %vm250_vm1, %v1130_v14 }
  0x2b   : > { %999 = vmatprep.mubr.msk.bf16.mxu1 %vm250_vm1, %v1131_v15  ;;  %1027 = vmatprep.mubr.msk.bf16.mxu0 %vm250_vm1, %v1132_v16 }
  0x32   : > { %1000 = vmatmul.mubr.msk.bf16.gmra.mrb[12].mxu1 %vm250_vm1, %v1133_v17  ;;  %1028 = vmatmul.mubr.msk.bf16.gmra.mrb[4].mxu0 %vm250_vm1, %v1134_v18 }
  0x33   : > { %1013 = vmatprep.mubr.msk.bf16.mxu1 %vm250_vm1, %v1126_v10  ;;  %1031 = vmatprep.mubr.msk.bf16.mxu0 %vm250_vm1, %v1135_v19 }
  0x3a   : > { %1014 = vmatmul.mubr.msk.bf16.vlgmr.msra.gmra.mrb[8].mxu1 %vm250_vm1, %v1127_v11  ;;  %1032 = vmatmul.mubr.msk.bf16.gmra.mrb[8].mxu0 %vm250_vm1, %v1136_v20 }
  0x3b   : > { %1017 = vmatprep.mubr.msk.bf16.mxu1 %vm250_vm1, %v1129_v13  ;;  %1035 = vmatprep.mubr.msk.bf16.mxu0 %vm250_vm1, %v1137_v21 }
  0x42   : > { %1018 = vmatmul.mubr.msk.bf16.gmra.mrb[12].mxu1 %vm250_vm1, %v1131_v15  ;;  %1036 = vmatmul.mubr.msk.bf16.gmra.mrb[12].mxu0 %vm250_vm1, %v1138_v22 }
  0xed   : > { %v989_v23 = vpop.f32.mrb[0].mxu1 }
  0xee   : > { %v313_v24 = vpop.f32.mrb[1].mxu1 }
  0xef   : > { %v990_v25 = vpop.f32.mrb[2].mxu1 }
  0xf0   : > { %v316_v26 = vpop.f32.mrb[3].mxu1 }
  0xf5   : > { %v993_v27 = vpop.f32.mrb[4].mxu1 }
  0xf6   : > { %v329_v28 = vpop.f32.mrb[5].mxu1 }
  0xf7   : > { %v994_v29 = vpop.f32.mrb[6].mxu1 }
  0xf8   : > { %v332_v30 = vpop.f32.mrb[7].mxu1 }
  0xfd   : > { %v1025_v31 = vpop.f32.mrb[0].mxu0 }
  0xfe   : > { %v1041_v32 = vadd.f32 %v1025_v31, %v989_v23  ;;  %v614_v33 = vpop.f32.mrb[1].mxu0 }
  0xff   : > { %v1042_v34 = vadd.f32 %v614_v33, %v313_v24  ;;  %v1026_v35 = vpop.f32.mrb[2].mxu0 }
 0x100   : > { %v944_v36 = vpack.c.bf16 %v1041_v32, %v1041_v32  ;;  %v1043_v37 = vadd.f32 %v1026_v35, %v990_v25  ;;  %v617_v38 = vpop.f32.mrb[3].mxu0 }
 0x101   : > { %v942_v39 = vpack.c.bf16 %v1042_v34, %v1042_v34  ;;  %v1044_v40 = vadd.f32 %v617_v38, %v316_v26 }
 0x102   : > { %760 = vst.msk [vmem:[%s1298_s8 + $0x8] sm:$0xf] %vm757_vm2, %v944_v36  ;;  %v945_v41 = vpack.c.bf16 %v1043_v37, %v1043_v37 }
 0x103   : > { %758 = vst.msk [vmem:[%s1298_s8] sm:$0xf] %vm757_vm2, %v942_v39  ;;  %v943_v42 = vpack.c.bf16 %v1044_v40, %v1044_v40 }
 0x104   : > { %761 = vst.msk [vmem:[%s1298_s8 + $0xc] sm:$0xf] %vm757_vm2, %v945_v41 }
 0x105   : > { %759 = vst.msk [vmem:[%s1298_s8 + $0x4] sm:$0xf] %vm757_vm2, %v943_v42  ;;  %v1029_v43 = vpop.f32.mrb[4].mxu0 }
 0x106   : > { %v1045_v44 = vadd.f32 %v1029_v43, %v993_v27  ;;  %v630_v45 = vpop.f32.mrb[5].mxu0 }
 0x107   : > { %v1046_v46 = vadd.f32 %v630_v45, %v329_v28  ;;  %v1030_v47 = vpop.f32.mrb[6].mxu0 }
 0x108   : > { %v948_v48 = vpack.c.bf16 %v1045_v44, %v1045_v44  ;;  %v1047_v49 = vadd.f32 %v1030_v47, %v994_v29  ;;  %v633_v50 = vpop.f32.mrb[7].mxu0 }
 0x109   : > { %v946_v51 = vpack.c.bf16 %v1046_v46, %v1046_v46  ;;  %v1048_v52 = vadd.f32 %v633_v50, %v332_v30 }
 0x10a   : > { %764 = vst.msk [vmem:[%s1298_s8 + $0x18] sm:$0xf] %vm757_vm2, %v948_v48  ;;  %v949_v53 = vpack.c.bf16 %v1047_v49, %v1047_v49 }
 0x10b   : > { %762 = vst.msk [vmem:[%s1298_s8 + $0x10] sm:$0xf] %vm757_vm2, %v946_v51  ;;  %v947_v54 = vpack.c.bf16 %v1048_v52, %v1048_v52 }
 0x10c   : > { %765 = vst.msk [vmem:[%s1298_s8 + $0x1c] sm:$0xf] %vm757_vm2, %v949_v53 }
 0x10d   : > { %763 = vst.msk [vmem:[%s1298_s8 + $0x14] sm:$0xf] %vm757_vm2, %v947_v54  ;;  %v1015_v55 = vpop.f32.mrb[8].mxu1  ;;  %v1033_v56 = vpop.f32.mrb[8].mxu0 }
 0x10e   : > { %v1049_v57 = vadd.f32 %v1033_v56, %v1015_v55  ;;  %v458_v58 = vpop.f32.mrb[9].mxu1  ;;  %v646_v59 = vpop.f32.mrb[9].mxu0 }
 0x10f   : > { %v1050_v60 = vadd.f32 %v646_v59, %v458_v58  ;;  %v1016_v61 = vpop.f32.mrb[10].mxu1  ;;  %v1034_v62 = vpop.f32.mrb[10].mxu0 }
 0x110   : > { %v952_v63 = vpack.c.bf16 %v1049_v57, %v1049_v57  ;;  %v1051_v0 = vadd.f32 %v1034_v62, %v1016_v61  ;;  %v461_v1 = vpop.f32.mrb[11].mxu1  ;;  %v649_v2 = vpop.f32.mrb[11].mxu0 }
 0x111   : > { %v950_v3 = vpack.c.bf16 %v1050_v60, %v1050_v60  ;;  %v1052_v4 = vadd.f32 %v649_v2, %v461_v1 }
 0x112   : > { %768 = vst.msk [vmem:[%s1298_s8 + $0x28] sm:$0xf] %vm757_vm2, %v952_v63  ;;  %v953_v5 = vpack.c.bf16 %v1051_v0, %v1051_v0 }
 0x113   : > { %766 = vst.msk [vmem:[%s1298_s8 + $0x20] sm:$0xf] %vm757_vm2, %v950_v3  ;;  %v951_v6 = vpack.c.bf16 %v1052_v4, %v1052_v4 }
 0x114   : > { %769 = vst.msk [vmem:[%s1298_s8 + $0x2c] sm:$0xf] %vm757_vm2, %v953_v5 }
 0x115   : > { %767 = vst.msk [vmem:[%s1298_s8 + $0x24] sm:$0xf] %vm757_vm2, %v951_v6  ;;  %v1019_v7 = vpop.f32.mrb[12].mxu1  ;;  %v1037_v8 = vpop.f32.mrb[12].mxu0 }
 0x116   : > { %v1053_v9 = vadd.f32 %v1037_v8, %v1019_v7  ;;  %v474_v10 = vpop.f32.mrb[13].mxu1  ;;  %v662_v11 = vpop.f32.mrb[13].mxu0 }
 0x117   : > { %v1054_v12 = vadd.f32 %v662_v11, %v474_v10  ;;  %v1020_v13 = vpop.f32.mrb[14].mxu1  ;;  %v1038_v14 = vpop.f32.mrb[14].mxu0 }
 0x118   : > { %v956_v15 = vpack.c.bf16 %v1053_v9, %v1053_v9  ;;  %v1055_v16 = vadd.f32 %v1038_v14, %v1020_v13  ;;  %v477_v17 = vpop.f32.mrb[15].mxu1  ;;  %v665_v18 = vpop.f32.mrb[15].mxu0 }
 0x119   : > { %v954_v19 = vpack.c.bf16 %v1054_v12, %v1054_v12  ;;  %v1056_v20 = vadd.f32 %v665_v18, %v477_v17 }
 0x11a   : > { %772 = vst.msk [vmem:[%s1298_s8 + $0x38] sm:$0xf] %vm757_vm2, %v956_v15  ;;  %v957_v21 = vpack.c.bf16 %v1055_v16, %v1055_v16 }
 0x11b   : > { %770 = vst.msk [vmem:[%s1298_s8 + $0x30] sm:$0xf] %vm757_vm2, %v954_v19  ;;  %v955_v22 = vpack.c.bf16 %v1056_v20, %v1056_v20 }
 0x11c   : > { %773 = vst.msk [vmem:[%s1298_s8 + $0x3c] sm:$0xf] %vm757_vm2, %v957_v21 }
 0x11d   : > { %771 = vst.msk [vmem:[%s1298_s8 + $0x34] sm:$0xf] %vm757_vm2, %v955_v22 }
 0x11e PF: > { %s12_s13 = sadd.s32 1, %s1177_s13   ;;  %s1350_s9 = smov %s1169_s11 }
 0x11f   : > { %p9_p8 = scmp.ge.s32.totalorder %s12_s13, 6   ;;  %s1351_s10 = smov %s1173_s12 }
 0x120   : > { %s1352_s11 = smov %s1355_s14  ;;  %s1353_s12 = smov %s1359_s15 }
 0x121   :  { %11 = sbr.rel (!%p9_p8) target bundleno = 3 (0x3), region = 60 }

</bundles_post_ra>
